<compile_context>
chip_gen: v7x
topology: tpu7x:2x2x1
jax: 0.10.0
libtpu: 0.0.40
codegen_flags: <defaults>
</compile_context>

<pallas_src>
import math

import jax
import jax.numpy as jnp
from jax.experimental import pallas as pl
from jax.experimental.pallas import tpu as pltpu

_LANE = 128


def _round_up(v, m):
    return ((v + m - 1) // m) * m


def _vmem_capacity_bytes():
    try:
        return int(pltpu.get_tpu_info().vmem_capacity_bytes)
    except Exception:
        return 64 * 1024 * 1024  # conservative fallback: v7x per-TensorCore


def _default_layer1_bf16():
    # bf16 VALU exists on v6e/v7x; keep layer-1 math in f32 on v5e and older.
    try:
        kind = jax.devices()[0].device_kind.lower()
    except Exception:
        return False
    return not any(t in kind for t in ("v2", "v3", "v4", "v5"))


def _estimate_vmem_bytes(tile_n, nfeat, hidden, out_dim,
                         x_isize, out_isize, l1_isize, mm_isize):
    """Scoped-VMEM estimate for one grid step (lane padding included)."""
    x_lanes = _round_up(nfeat, _LANE)      # (tile_n, 3) is lane-padded to 128
    out_lanes = _round_up(out_dim, _LANE)  # (tile_n, 108) lane-padded to 128
    hid_lanes = _round_up(hidden, _LANE)
    # double-buffered streamed tiles (x in, out back)
    stream = 2 * tile_n * (x_lanes * x_isize + out_lanes * out_isize)
    # resident weights / biases (double-buffered by BlockSpec, still tiny)
    weights = 2 * (x_lanes * hidden * l1_isize + hid_lanes * l1_isize
                   + hidden * out_lanes * mm_isize + out_lanes * 4)
    # in-kernel temporaries: h (layer-1 dtype) + matmul-operand copy + f32 acc
    temps = tile_n * (hid_lanes * l1_isize + hid_lanes * mm_isize
                      + out_lanes * 4)
    return stream + weights + temps


def _pick_tile_n(n, requested, nfeat, hidden, out_dim,
                 x_isize, out_isize, l1_isize, mm_isize, budget):
    if n <= 16:
        return n  # one block equal to the full batch dim (legal: == array dim)
    # Cap at ~ceil(n/2) so the grid always has >= 2 steps -> both v7x
    # TensorCores get work under dimension_semantics=("parallel",).
    cap = max(16, _round_up(-(-n // 2), 16))
    tile = min(_round_up(max(16, requested), 16), cap)
    # Shrink until the (corrected) VMEM estimate fits the budget.
    while tile > 16 and _estimate_vmem_bytes(
            tile, nfeat, hidden, out_dim,
            x_isize, out_isize, l1_isize, mm_isize) > budget:
        tile = max(16, _round_up(tile // 2, 16))
    return tile


def _pos2weight_kernel(x_ref, w1_ref, b1_ref, w2_ref, b2_ref, o_ref):
    """One batch tile of: relu(x @ w1 + b1) @ w2 + b2."""
    l1_dt = w1_ref.dtype            # layer-1 (VPU) compute dtype (f32 or bf16)
    x = x_ref[...].astype(l1_dt)    # (tile_n, nfeat); nfeat is tiny (3)
    w1 = w1_ref[...]                # (nfeat, hidden)

    # Layer 1: contraction depth is only nfeat (=3), far too small for the
    # MXU -> unrolled broadcast multiply-adds on the VPU.
    h = b1_ref[...].astype(l1_dt)                       # (1, hidden) broadcasts
    for f in range(x_ref.shape[1]):                     # static unroll
        h = h + x[:, f:f + 1] * w1[f:f + 1, :]          # (tile_n, hidden)
    h = jnp.maximum(h, 0.0)                             # ReLU (keeps l1_dt)

    # Layer 2: the real matmul on the MXU.  With bf16 operands this is a
    # single-pass matmul; accumulation stays f32 via preferred_element_type.
    out = jnp.dot(h.astype(w2_ref.dtype), w2_ref[...],
                  preferred_element_type=jnp.float32)
    out = out + b2_ref[...].astype(jnp.float32)
    o_ref[...] = out.astype(o_ref.dtype)


def prepare_pos2weight_params(w1, b1, w2, b2, *, mxu_bf16=True,
                              layer1_bf16=None):
    """One-time weight prep (hoist the bf16 casts out of the forward path)."""
    if layer1_bf16 is None:
        layer1_bf16 = mxu_bf16 and _default_layer1_bf16()
    l1_dt = jnp.bfloat16 if layer1_bf16 else jnp.float32
    mm_dt = jnp.bfloat16 if mxu_bf16 else jnp.float32
    if b1.ndim == 1:
        b1 = b1[None, :]
    if b2.ndim == 1:
        b2 = b2[None, :]
    return (w1.astype(l1_dt), b1.astype(l1_dt),
            w2.astype(mm_dt), b2.astype(jnp.float32))


def pos2weight_forward(x, w1, b1, w2, b2, *, tile_n=8192,
                       mxu_bf16=True, layer1_bf16=None, out_dtype=None):
    """Fused relu(x @ w1 + b1) @ w2 + b2, tiled over the batch axis.

    Writes the exact (N, out_dim) output (no pad+slice pass).  Set
    out_dtype=jnp.bfloat16 to halve the dominant HBM write stream when the
    consumer does not strictly need f32 conv weights.
    """
    n, nfeat = x.shape
    hidden = w1.shape[1]
    out_dim = w2.shape[1]

    if b1.ndim == 1:
        b1 = b1[None, :]
    if b2.ndim == 1:
        b2 = b2[None, :]

    if layer1_bf16 is None:
        layer1_bf16 = mxu_bf16 and _default_layer1_bf16()
    l1_dt = jnp.bfloat16 if layer1_bf16 else jnp.float32
    mm_dt = jnp.bfloat16 if mxu_bf16 else jnp.float32
    out_dt = jnp.dtype(out_dtype) if out_dtype is not None else jnp.dtype(x.dtype)

    # No-ops if params were already prepared with prepare_pos2weight_params.
    w1 = w1 if w1.dtype == l1_dt else w1.astype(l1_dt)
    b1 = b1 if b1.dtype == l1_dt else b1.astype(l1_dt)
    w2 = w2 if w2.dtype == mm_dt else w2.astype(mm_dt)
    b2 = b2 if b2.dtype == jnp.float32 else b2.astype(jnp.float32)

    x_isize = jnp.dtype(x.dtype).itemsize
    out_isize = out_dt.itemsize
    l1_isize = jnp.dtype(l1_dt).itemsize
    mm_isize = jnp.dtype(mm_dt).itemsize

    # VMEM budget: well below physical capacity (v7x has only 64 MiB/TC).
    budget = min(int(0.72 * _vmem_capacity_bytes()), 100 * 1024 * 1024)
    tile_n = _pick_tile_n(n, tile_n, nfeat, hidden, out_dim,
                          x_isize, out_isize, l1_isize, mm_isize, budget)

    est = _estimate_vmem_bytes(tile_n, nfeat, hidden, out_dim,
                               x_isize, out_isize, l1_isize, mm_isize)
    vmem_limit = None
    if est > 12 * 1024 * 1024:
        vmem_limit = min(budget, max(int(1.3 * est) + (4 << 20), 32 << 20))

    grid = (pl.cdiv(n, tile_n),)  # ragged last block is handled by Pallas

    cost = pl.CostEstimate(
        flops=2 * n * (nfeat * hidden + hidden * out_dim),
        transcendentals=0,
        bytes_accessed=(n * nfeat * x_isize + n * out_dim * out_isize
                        + w1.size * l1_isize + b1.size * l1_isize
                        + w2.size * mm_isize + b2.size * 4),
    )

    out = pl.pallas_call(
        _pos2weight_kernel,
        out_shape=jax.ShapeDtypeStruct((n, out_dim), out_dt),
        grid_spec=pltpu.PrefetchScalarGridSpec(
            num_scalar_prefetch=0,
            grid=grid,
            in_specs=[
                pl.BlockSpec((tile_n, nfeat), lambda i: (i, 0)),
                pl.BlockSpec((nfeat, hidden), lambda i: (0, 0)),
                pl.BlockSpec((1, hidden), lambda i: (0, 0)),
                pl.BlockSpec((hidden, out_dim), lambda i: (0, 0)),
                pl.BlockSpec((1, out_dim), lambda i: (0, 0)),
            ],
            out_specs=pl.BlockSpec((tile_n, out_dim), lambda i: (i, 0)),
        ),
        compiler_params=pltpu.CompilerParams(
            dimension_semantics=("parallel",),
            vmem_limit_bytes=vmem_limit,
        ),
        cost_estimate=cost,
    )(x, w1, b1, w2, b2)
    return out


def init_pos2weight_params(key, inC, nfeature=3, kernel_size=3, outC=3,
                           dtype=jnp.float32):
    """Deterministic init matching nn.Linear defaults: U(-1/sqrt(fan_in), +)."""
    hidden = 256
    out_dim = kernel_size * kernel_size * inC * outC
    k1, k2, k3, k4 = jax.random.split(key, 4)

    bound1 = 1.0 / math.sqrt(nfeature)
    w1 = jax.random.uniform(k1, (nfeature, hidden), dtype, -bound1, bound1)
    b1 = jax.random.uniform(k2, (1, hidden), dtype, -bound1, bound1)

    bound2 = 1.0 / math.sqrt(hidden)
    w2 = jax.random.uniform(k3, (hidden, out_dim), dtype, -bound2, bound2)
    b2 = jax.random.uniform(k4, (1, out_dim), dtype, -bound2, bound2)
    return w1, b1, w2, b2


def pos2weight_reference(x, w1, b1, w2, b2):
    h = jnp.maximum(x @ w1 + b1, 0.0)
    return h @ w2 + b2


if __name__ == "__main__":
    # Module hyperparameters (Pos2Weight defaults).
    inC = 4            # input channels of the upsampled feature map
    nfeature = 3       # per-position meta features (rel_h, rel_w, 1/scale)
    kernel_size = 3
    outC = 3
    out_dim = kernel_size * kernel_size * inC * outC  # 108

    # x is the flattened position matrix: (N, nfeature), N = outH * outW.
    # N is NOT a multiple of the tile to exercise the ragged last block.
    N = 15 * 20        # 300
    key = jax.random.PRNGKey(0)
    kx, kp = jax.random.split(key)
    x = jax.random.normal(kx, (N, nfeature), dtype=jnp.float32)
    w1, b1, w2, b2 = init_pos2weight_params(
        kp, inC, nfeature=nfeature, kernel_size=kernel_size, outC=outC)

    ref = pos2weight_reference(x, w1, b1, w2, b2)

    # 1) Strict f32 path: exact module semantics, tight tolerance.
    out_f32 = pos2weight_forward(x, w1, b1, w2, b2,
                                 mxu_bf16=False, layer1_bf16=False)
    out_f32 = jax.block_until_ready(out_f32)
    assert out_f32.shape == (N, out_dim), out_f32.shape
    assert out_f32.dtype == jnp.float32
    assert jnp.allclose(out_f32, ref, atol=1e-4, rtol=1e-4), "f32 path mismatch"

    # 2) Default fast path: bf16 MXU operands, f32 accumulation, f32 output.
    out_fast = jax.block_until_ready(pos2weight_forward(x, w1, b1, w2, b2))
    assert out_fast.shape == (N, out_dim), out_fast.shape
    assert jnp.allclose(out_fast.astype(jnp.float32), ref,
                        atol=7.5e-2, rtol=7.5e-2), "bf16-MXU path mismatch"

    # 3) bf16 output (halves the dominant HBM write stream), prepared weights.
    w1p, b1p, w2p, b2p = prepare_pos2weight_params(w1, b1, w2, b2)
    out_bf16 = jax.block_until_ready(
        pos2weight_forward(x, w1p, b1p, w2p, b2p, out_dtype=jnp.bfloat16))
    assert out_bf16.dtype == jnp.bfloat16
    assert jnp.allclose(out_bf16.astype(jnp.float32), ref,
                        atol=1e-1, rtol=1e-1), "bf16-output path mismatch"

    print("KERNEL_OK")
</pallas_src>

<mosaic_0001>
module attributes {stable_mosaic.version = 11 : i64} {
  func.func @_pos2weight_kernel(%arg0: i32, %arg1: memref<160x3xf32, #tpu.memory_space<vmem>>, %arg2: memref<3x256xf32, #tpu.memory_space<vmem>>, %arg3: memref<1x256xf32, #tpu.memory_space<vmem>>, %arg4: memref<256x108xf32, #tpu.memory_space<vmem>>, %arg5: memref<1x108xf32, #tpu.memory_space<vmem>>, %arg6: memref<160x108xf32, #tpu.memory_space<vmem>>) attributes {dimension_semantics = [#tpu.dimension_semantics<parallel>], iteration_bounds = array<i64: 2>, scalar_prefetch = 0 : i64, scratch_operands = 0 : i64, tpu.core_type = #tpu.core_type<tc>, window_params = [{transform_indices = @transform_0, window_bounds = array<i64: 160, 3>}, {pipeline_mode = #tpu.pipeline_mode<synchronous>, transform_indices = @transform_1, window_bounds = array<i64: 3, 256>}, {pipeline_mode = #tpu.pipeline_mode<synchronous>, transform_indices = @transform_2, window_bounds = array<i64: 1, 256>}, {pipeline_mode = #tpu.pipeline_mode<synchronous>, transform_indices = @transform_3, window_bounds = array<i64: 256, 108>}, {pipeline_mode = #tpu.pipeline_mode<synchronous>, transform_indices = @transform_4, window_bounds = array<i64: 1, 108>}, {transform_indices = @transform_5, window_bounds = array<i64: 160, 108>}]} {
    %c0 = arith.constant 0 : index
    %c0_0 = arith.constant 0 : index
    %0 = vector.load %arg1[%c0, %c0_0] : memref<160x3xf32, #tpu.memory_space<vmem>>, vector<160x3xf32>
    %c0_1 = arith.constant 0 : index
    %c0_2 = arith.constant 0 : index
    %1 = vector.load %arg2[%c0_1, %c0_2] : memref<3x256xf32, #tpu.memory_space<vmem>>, vector<3x256xf32>
    %c0_3 = arith.constant 0 : index
    %c0_4 = arith.constant 0 : index
    %2 = vector.load %arg3[%c0_3, %c0_4] : memref<1x256xf32, #tpu.memory_space<vmem>>, vector<1x256xf32>
    %3 = vector.extract_strided_slice %0 {offsets = [0, 0], sizes = [160, 1], strides = [1, 1]} : vector<160x3xf32> to vector<160x1xf32>
    %4 = vector.extract_strided_slice %1 {offsets = [0, 0], sizes = [1, 256], strides = [1, 1]} : vector<3x256xf32> to vector<1x256xf32>
    %5 = vector.broadcast %3 : vector<160x1xf32> to vector<160x256xf32>
    %6 = vector.broadcast %4 : vector<1x256xf32> to vector<160x256xf32>
    %7 = arith.mulf %5, %6 : vector<160x256xf32>
    %8 = vector.broadcast %2 : vector<1x256xf32> to vector<160x256xf32>
    %9 = arith.addf %8, %7 : vector<160x256xf32>
    %10 = vector.extract_strided_slice %0 {offsets = [0, 1], sizes = [160, 1], strides = [1, 1]} : vector<160x3xf32> to vector<160x1xf32>
    %11 = vector.extract_strided_slice %1 {offsets = [1, 0], sizes = [1, 256], strides = [1, 1]} : vector<3x256xf32> to vector<1x256xf32>
    %12 = vector.broadcast %10 : vector<160x1xf32> to vector<160x256xf32>
    %13 = vector.broadcast %11 : vector<1x256xf32> to vector<160x256xf32>
    %14 = arith.mulf %12, %13 : vector<160x256xf32>
    %15 = arith.addf %9, %14 : vector<160x256xf32>
    %16 = vector.extract_strided_slice %0 {offsets = [0, 2], sizes = [160, 1], strides = [1, 1]} : vector<160x3xf32> to vector<160x1xf32>
    %17 = vector.extract_strided_slice %1 {offsets = [2, 0], sizes = [1, 256], strides = [1, 1]} : vector<3x256xf32> to vector<1x256xf32>
    %18 = vector.broadcast %16 : vector<160x1xf32> to vector<160x256xf32>
    %19 = vector.broadcast %17 : vector<1x256xf32> to vector<160x256xf32>
    %20 = arith.mulf %18, %19 : vector<160x256xf32>
    %21 = arith.addf %15, %20 : vector<160x256xf32>
    %cst = arith.constant 0.000000e+00 : f32
    %22 = vector.broadcast %cst : f32 to vector<160x256xf32>
    %23 = arith.maximumf %21, %22 : vector<160x256xf32>
    %c0_5 = arith.constant 0 : index
    %c0_6 = arith.constant 0 : index
    %24 = vector.load %arg4[%c0_5, %c0_6] : memref<256x108xf32, #tpu.memory_space<vmem>>, vector<256x108xf32>
    %cst_7 = arith.constant dense<0.000000e+00> : vector<160x108xf32>
    %25 = tpu.matmul %23, %24, %cst_7 {dimension_numbers = #tpu.dot_dimension_numbers<[1], [0], [0], [1], [0, 0, 1, 1], [], []>} : vector<160x256xf32>, vector<256x108xf32>, vector<160x108xf32> -> vector<160x108xf32>
    %c0_8 = arith.constant 0 : index
    %c0_9 = arith.constant 0 : index
    %26 = vector.load %arg5[%c0_8, %c0_9] : memref<1x108xf32, #tpu.memory_space<vmem>>, vector<1x108xf32>
    %27 = vector.broadcast %26 : vector<1x108xf32> to vector<160x108xf32>
    %28 = arith.addf %25, %27 : vector<160x108xf32>
    %c0_10 = arith.constant 0 : index
    %c0_11 = arith.constant 0 : index
    %29 = vector.load %arg6[%c0_10, %c0_11] : memref<160x108xf32, #tpu.memory_space<vmem>>, vector<160x108xf32>
    tpu.vector_store %arg6[%c0_10, %c0_11], %28 {strides = array<i32>} : memref<160x108xf32, #tpu.memory_space<vmem>>, vector<160x108xf32>,
    return
  }
  func.func @transform_0(%arg0: i32) -> (i32, i32) {
    %c0_i32 = arith.constant 0 : i32
    %c0_i32_0 = arith.constant 0 : i32
    return %arg0, %c0_i32 : i32, i32
  }
  func.func @transform_1(%arg0: i32) -> (i32, i32) {
    %c0_i32 = arith.constant 0 : i32
    %c0_i32_0 = arith.constant 0 : i32
    %c0_i32_1 = arith.constant 0 : i32
    return %c0_i32, %c0_i32_0 : i32, i32
  }
  func.func @transform_2(%arg0: i32) -> (i32, i32) {
    %c0_i32 = arith.constant 0 : i32
    %c0_i32_0 = arith.constant 0 : i32
    %c0_i32_1 = arith.constant 0 : i32
    return %c0_i32, %c0_i32_0 : i32, i32
  }
  func.func @transform_3(%arg0: i32) -> (i32, i32) {
    %c0_i32 = arith.constant 0 : i32
    %c0_i32_0 = arith.constant 0 : i32
    %c0_i32_1 = arith.constant 0 : i32
    return %c0_i32, %c0_i32_0 : i32, i32
  }
  func.func @transform_4(%arg0: i32) -> (i32, i32) {
    %c0_i32 = arith.constant 0 : i32
    %c0_i32_0 = arith.constant 0 : i32
    %c0_i32_1 = arith.constant 0 : i32
    return %c0_i32, %c0_i32_0 : i32, i32
  }
  func.func @transform_5(%arg0: i32) -> (i32, i32) {
    %c0_i32 = arith.constant 0 : i32
    %c0_i32_0 = arith.constant 0 : i32
    return %arg0, %c0_i32 : i32, i32
  }
}

</mosaic_0001>

<bundles_post_ra>
// kernel: tpu_custom_call.1
= control target key start
LH: loop header
LB: loop body
LE: loop exit
PB: predicated region body
PF: predicated region fallthrough
CT: control target
= control target key end

     0   :  { %10 = vsyncpa [#allocation3], 0  ;;  %s2095_s0 = inlined_call_operand.vmem [shape: f32[300,3], index: 0, kind: input, shape index: {}]   ;;  %s2096_s1 = inlined_call_operand.vmem [shape: f32[3,256], index: 1, kind: input, shape index: {}]   ;;  %s2097_s2 = inlined_call_operand.vmem [shape: f32[1,256], index: 2, kind: input, shape index: {}]   ;;  %s2098_s3 = inlined_call_operand.vmem [shape: f32[256,108], index: 3, kind: input, shape index: {}]   ;;  %s2099_s4 = inlined_call_operand.vmem [shape: f32[1,108], index: 4, kind: input, shape index: {}]   ;;  %s2100_s5 = inlined_call_operand.hbm [shape: f32[300,108], index: 5, kind: output, shape index: {}]  }
   0x1   :  { %12 = vsyncpa [#allocation3 + $0x1], 0  ;;  %s1458_s18 = smov 0   ;;  %s1460_s19 = smov 0  }
   0x2   :  { %s1462_s20 = smov 0   ;;  %s1464_s21 = smov 0  }
   0x3 LB: > { %s1479_s22 = sadd.s32 4294967295, %s1419_s21   ;;  %s1185_s23 = sadd.s32 4294967294, %s1419_s21   ;;  %s1419_s21 = sphi %s1464_s21, %s2106_s21   ;;  %s1415_s20 = sphi %s1462_s20, %s2105_s20   ;;  %s1411_s19 = sphi %s1460_s19, %s2104_s19   ;;  %s1407_s18 = sphi %s1458_s18, %s2103_s18  }
   0x4   : > { %s1483_s24 = sadd.s32 1, %s1419_s21   ;;  %s135_s25 = sadd.s32 1, %s1415_s20 }
   0x5   : > { %s132_s26 = ssub.s32 %s1419_s21, %s1483_s24  ;;  %p145_p0 = scmp.ne.s32.totalorder %s1415_s20, %s1411_s19 }
   0x6   : > { %p133_p1 = scmp.eq.s32.totalorder %s132_s26, 0  ;;  %p146_p2 = scmp.eq.s32.totalorder %s1479_s22, 1 }
   0x7   : > { %p151_p3 = scmp.ne.s32.totalorder %s1411_s19, %s1407_s18  ;;  %p152_p4 = scmp.eq.s32.totalorder %s1185_s23, 1 }
   0x8   : > { %s1494_s27 = scalar_select %p133_p1, %s1415_s20, %s135_s25  }
   0x9   : > { %p1496_p5 = por %p146_p2, %p145_p0  ;;  %p1500_p6 = por %p152_p4, %p151_p3 }
   0xa   : > { %p1188_p7 = scmp.ge.s32.totalorder %s1419_s21, 1  ;;  %p199_p8 = scmp.lt.s32.totalorder %s1419_s21, 3 }
   0xc   : > { %p200_p9 = pnand %p1188_p7, %p199_p8 }
   0xd   : > { %s1507_s30 = smul.u32 (!%p200_p9), 20, %s1479_s22  ;;  %v878_v0 = vld [vmem:[%s2098_s3] sm:$0xff] (!%p200_p9)  ;;  %v1421_v1 = vmov (!%p200_p9), 1   ;;  %v1422_v2 = vmov (!%p200_p9), 0   ;;  %v879_v3 = vld [vmem:[%s2098_s3 + $0x8] sm:$0xff] (!%p200_p9)  ;;  %v880_v4 = vld [vmem:[%s2098_s3 + $0x10] sm:$0xff] (!%p200_p9) }
   0xe   : > { %203 = sbr.rel (%p200_p9) target bundleno = 584 (0x248), region = 40  ;;  %1325 = vset.pattern.permute.xlu1 (!%p200_p9), %v1421_v1  ;;  %1324 = vset.pattern.permute.xlu0 (!%p200_p9), %v1422_v2  ;;  %v881_v5 = vld [vmem:[%s2098_s3 + $0x18] sm:$0xff] (!%p200_p9)  ;;  %v1423_v6 = vmov (!%p200_p9), 0.0|0.0   ;;  %v1200_v7 = vpack.c.bf16 (!%p200_p9), %v879_v3, %v878_v0  ;;  %v882_v9 = vld [vmem:[%s2098_s3 + $0x20] sm:$0xff] (!%p200_p9)  ;;  %v883_v10 = vld [vmem:[%s2098_s3 + $0x28] sm:$0xff] (!%p200_p9)  ;;  %v1424_v25 = vmov (!%p200_p9), 2  }
   0xf   : > { %p236_p10 = scmp.lt.s32.totalorder (!%p200_p9), %s1507_s30, 37  ;;  %1199 = vmatprep.subr.bf16.mxu0 (!%p200_p9), %v1423_v6  ;;  %1247 = vmatprep.subr.bf16.mxu1 (!%p200_p9), %v1423_v6  ;;  %v1203_v8 = vpack.c.bf16 (!%p200_p9), %v881_v5, %v880_v4  ;;  %v1206_v12 = vpack.c.bf16 (!%p200_p9), %v883_v10, %v882_v9  ;;  %v884_v13 = vld [vmem:[%s2098_s3 + $0x30] sm:$0xff] (!%p200_p9)  ;;  %v885_v14 = vld [vmem:[%s2098_s3 + $0x38] sm:$0xff] (!%p200_p9)  ;;  %v886_v17 = vld [vmem:[%s2098_s3 + $0x40] sm:$0xff] (!%p200_p9)  ;;  %v373_v9 = vlaneseq (!%p200_p9)  ;;  %vm1082_vm0 = vcmask (!%p200_p9), 883712  }
  0x10   : > { %1201 = vmatpush1.bf16.msra.mxu0 (!%p200_p9), %v1200_v7  ;;  %1263 = vmatpush1.bf16.msra.mxu1 (!%p200_p9), %v1200_v7  ;;  %v1209_v16 = vpack.c.bf16 (!%p200_p9), %v885_v14, %v884_v13  ;;  %v887_v18 = vld [vmem:[%s2098_s3 + $0x48] sm:$0xff] (!%p200_p9)  ;;  %v888_v22 = vld [vmem:[%s2098_s3 + $0x50] sm:$0xff] (!%p200_p9)  ;;  %v889_v23 = vld [vmem:[%s2098_s3 + $0x58] sm:$0xff] (!%p200_p9) }
  0x11   : > { %1202 = vmatprep.subr.bf16.mxu0 (!%p200_p9), %v1423_v6  ;;  %1248 = vmatprep.subr.bf16.mxu1 (!%p200_p9), %v1423_v6  ;;  %v1212_v21 = vpack.c.bf16 (!%p200_p9), %v887_v18, %v886_v17  ;;  %v1215_v24 = vpack.c.bf16 (!%p200_p9), %v889_v23, %v888_v22  ;;  %v890_v26 = vld [vmem:[%s2098_s3 + $0x60] sm:$0xff] (!%p200_p9)  ;;  %v891_v27 = vld [vmem:[%s2098_s3 + $0x68] sm:$0xff] (!%p200_p9)  ;;  %v892_v29 = vld [vmem:[%s2098_s3 + $0x70] sm:$0xff] (!%p200_p9)  ;;  %v374_v10 = vshrl.u32 (!%p200_p9), %v373_v9, 7 }
  0x12   : > { %v1218_v28 = vpack.c.bf16 (!%p200_p9), %v891_v27, %v890_v26  ;;  %v893_v30 = vld [vmem:[%s2098_s3 + $0x78] sm:$0xff] (!%p200_p9)  ;;  %v894_v33 = vld [vmem:[%s2098_s3 + $0x80] sm:$0xff] (!%p200_p9)  ;;  %v895_v34 = vld [vmem:[%s2098_s3 + $0x88] sm:$0xff] (!%p200_p9) }
  0x13   : > { %v1221_v32 = vpack.c.bf16 (!%p200_p9), %v893_v30, %v892_v29  ;;  %v1224_v36 = vpack.c.bf16 (!%p200_p9), %v895_v34, %v894_v33  ;;  %v896_v37 = vld [vmem:[%s2098_s3 + $0x90] sm:$0xff] (!%p200_p9)  ;;  %v897_v38 = vld [vmem:[%s2098_s3 + $0x98] sm:$0xff] (!%p200_p9)  ;;  %v898_v42 = vld [vmem:[%s2098_s3 + $0xa0] sm:$0xff] (!%p200_p9)  ;;  %v568_v17 = vsub.s32 (!%p200_p9), 5, %v374_v10  ;;  %v742_v23 = vsub.s32 (!%p200_p9), 2, %v374_v10 }
  0x14   : > { %1204 = vmatpush1.bf16.msra.mxu0 (!%p200_p9), %v1203_v8  ;;  %1264 = vmatpush1.bf16.msra.mxu1 (!%p200_p9), %v1203_v8  ;;  %v1227_v41 = vpack.c.bf16 (!%p200_p9), %v897_v38, %v896_v37  ;;  %v899_v43 = vld [vmem:[%s2098_s3 + $0xa8] sm:$0xff] (!%p200_p9)  ;;  %v900_v46 = vld [vmem:[%s2098_s3 + $0xb0] sm:$0xff] (!%p200_p9)  ;;  %v901_v47 = vld [vmem:[%s2098_s3 + $0xb8] sm:$0xff] (!%p200_p9) }
  0x15   : > { %s237_s14 = scalar_select %p236_p10, %s1507_s30, 37  ;;  %1205 = vmatprep.subr.bf16.mxu0 %v1423_v6  ;;  %1249 = vmatprep.subr.bf16.mxu1 %v1423_v6  ;;  %v1230_v45 = vpack.c.bf16 %v899_v43, %v898_v42  ;;  %v1233_v49 = vpack.c.bf16 %v901_v47, %v900_v46  ;;  %v902_v50 = vld [vmem:[%s2098_s3 + $0xc0] sm:$0xff]  ;;  %v903_v51 = vld [vmem:[%s2098_s3 + $0xc8] sm:$0xff]  ;;  %v904_v54 = vld [vmem:[%s2098_s3 + $0xd0] sm:$0xff] }
  0x16   : > { %v1236_v53 = vpack.c.bf16 %v903_v51, %v902_v50  ;;  %v905_v55 = vld [vmem:[%s2098_s3 + $0xd8] sm:$0xff]  ;;  %v906_v59 = vld [vmem:[%s2098_s3 + $0xe0] sm:$0xff]  ;;  %v907_v60 = vld [vmem:[%s2098_s3 + $0xe8] sm:$0xff]  ;;  %s1112_s13 = ssub.s32 (%p1496_p5), 38, %s1507_s30 }
  0x17   : > { %s1189_s25 = sshll.u32 %s237_s14, 3  ;;  %v1239_v57 = vpack.c.bf16 %v905_v55, %v904_v54  ;;  %v1242_v61 = vpack.c.bf16 %v907_v60, %v906_v59  ;;  %v908_v62 = vld [vmem:[%s2098_s3 + $0xf0] sm:$0xff]  ;;  %v909_v63 = vld [vmem:[%s2098_s3 + $0xf8] sm:$0xff]  ;;  %v270_v13 = vld [vmem:[%s2096_s1] sm:$0x77]  ;;  %p1113_p11 = scmp.lt.s32.totalorder (%p1496_p5), %s1112_s13, 20 }
  0x18   : > { %s1538_s7 = scalar_lea.vmem %s2095_s0, %s1189_s25  ;;  %1207 = vmatpush1.bf16.msra.mxu0 %v1206_v12  ;;  %1265 = vmatpush1.bf16.msra.mxu1 %v1206_v12  ;;  %v1245_v0 = vpack.c.bf16 %v909_v63, %v908_v62  ;;  %v379_v12 = vsub.s32 4, %v374_v10  ;;  %v271_v22 = vld [vmem:[%s2097_s2] sm:$0x3]  ;;  %v569_v27 = vrot.slane %v270_v13, %v568_v17  ;;  %v743_v34 = vrot.slane %v270_v13, %v742_v23 }
  0x19   : > { %v250_v11 = vld [vmem:[%s1538_s7] sm:$0xff]  ;;  %v260_v15 = vld [vmem:[%s1538_s7 + $0x50] sm:$0xff]  ;;  %v251_v19 = vld [vmem:[%s1538_s7 + $0x8] sm:$0xff]  ;;  %1208 = vmatprep.subr.bf16.mxu0 %v1423_v6  ;;  %1250 = vmatprep.subr.bf16.mxu1 %v1423_v6 }
  0x1a   : > { %483 = vperm.xlu1 %1325, %v250_v11   ;;  %274 = vperm.xlu0 %1324, %v250_v11   ;;  %v1560_v20 = vld [vmem:[%s1538_s7 + $0x58] sm:$0xff]  ;;  %v252_v31 = vld [vmem:[%s1538_s7 + $0x10] sm:$0xff]  ;;  %v1612_v39 = vld [vmem:[%s1538_s7 + $0x60] sm:$0xff] }
  0x1b   : > { %v1601_v35 = vld [vmem:[%s1538_s7 + $0x18] sm:$0xff]  ;;  %v1616_v40 = vld [vmem:[%s1538_s7 + $0x20] sm:$0xff]  ;;  %v1629_v44 = vld [vmem:[%s1538_s7 + $0x28] sm:$0xff] }
  0x1c   : > { %1210 = vmatpush1.bf16.msra.mxu0 %v1209_v16  ;;  %1266 = vmatpush1.bf16.msra.mxu1 %v1209_v16  ;;  %v1642_v48 = vld [vmem:[%s1538_s7 + $0x30] sm:$0xff]  ;;  %v1656_v52 = vld [vmem:[%s1538_s7 + $0x38] sm:$0xff]  ;;  %v1670_v56 = vld [vmem:[%s1538_s7 + $0x40] sm:$0xff]  ;;  %v438_v16 = vsub.s32 1, %v374_v10 }
  0x1d   : > { %1211 = vmatprep.subr.bf16.mxu0 %v1423_v6  ;;  %1251 = vmatprep.subr.bf16.mxu1 %v1423_v6  ;;  %v263_v58 = vld [vmem:[%s1538_s7 + $0x68] sm:$0xff]  ;;  %v264_v3 = vld [vmem:[%s1538_s7 + $0x70] sm:$0xff]  ;;  %v265_v4 = vld [vmem:[%s1538_s7 + $0x78] sm:$0xff] }
  0x1e   : > { %523 = vperm.xlu1 %1325, %v260_v15   ;;  %324 = vperm.xlu0 %1324, %v260_v15   ;;  %v266_v5 = vld [vmem:[%s1538_s7 + $0x80] sm:$0xff]  ;;  %v1712_v7 = vld [vmem:[%s1538_s7 + $0x90] sm:$0xff]  ;;  %v1717_v8 = vld [vmem:[%s1538_s7 + $0x98] sm:$0xff]  ;;  %v565_v26 = vrot.slane %v270_v13, %v438_v16  ;;  %v1755_v37 = vrot.slane %v569_v27, %v438_v16 }
  0x20   : > { %1213 = vmatpush1.bf16.msra.mxu0 %v1212_v21  ;;  %1267 = vmatpush1.bf16.msra.mxu1 %v1212_v21 }
  0x21   : > { %1214 = vmatprep.subr.bf16.mxu0 %v1423_v6  ;;  %1252 = vmatprep.subr.bf16.mxu1 %v1423_v6 }
  0x22   : > { %1326 = vset.pattern.permute.xlu1 %v1422_v2  ;;  %279 = vperm.xlu0 %1324, %v251_v19  }
  0x23   : > { %329 = vperm.xlu1 %1326, %v1560_v20  }
  0x24   : > { %1216 = vmatpush1.bf16.msra.mxu0 %v1215_v24  ;;  %1268 = vmatpush1.bf16.msra.mxu1 %v1215_v24  ;;  %v746_v24 = vsub.s32 6, %v374_v10 }
  0x25   : > { %1217 = vmatprep.subr.bf16.mxu0 %v1423_v6  ;;  %1253 = vmatprep.subr.bf16.mxu1 %v1423_v6 }
  0x26   : > { %1327 = vset.pattern.permute.xlu0 %v1424_v25 }
  0x27   : > { %1328 = vset.pattern.permute.xlu1 %v1424_v25  ;;  %661 = vperm.xlu0 %1327, %v250_v11   ;;  %v375_v11 = vsub.s32 0, %v374_v10 }
  0x28   : > { %701 = vperm.xlu1 %1328, %v260_v15   ;;  %1219 = vmatpush1.bf16.msra.mxu0 %v1218_v28  ;;  %v380_v15 = vrot.slane %v270_v13, %v379_v12 }
  0x29   : > { %1269 = vmatpush1.bf16.msra.mxu1 %v1218_v28  ;;  %1220 = vmatprep.subr.bf16.mxu0 %v1423_v6  ;;  %v376_v14 = vrot.slane %v270_v13, %v375_v11  ;;  %v1745_v30 = vrot.slane %v271_v22, %v375_v11 }
  0x2a   : > { %1254 = vmatprep.subr.bf16.mxu1 %v1423_v6  ;;  %v1740_v21 = vrot.slane %v380_v15, %v375_v11 }
  0x2b   : > { %665 = vperm.xlu0 %1327, %v251_v19  }
  0x2c   : > { %1329 = vset.pattern.permute.xlu1 %v1421_v1  ;;  %1222 = vmatpush1.bf16.msra.mxu0 %v1221_v32 }
  0x2d   : > { %487 = vperm.xlu1 %1329, %v251_v19   ;;  %1270 = vmatpush1.bf16.msra.mxu1 %v1221_v32 }
  0x2e   : > { %1223 = vmatprep.subr.bf16.mxu0 %v1423_v6  ;;  %1255 = vmatprep.subr.bf16.mxu1 %v1423_v6 }
  0x2f   : > { %669 = vperm.xlu0 %1327, %v252_v31  }
  0x30   : > { %1225 = vmatpush1.bf16.msra.mxu0 %v1224_v36 }
  0x31   : > { %1330 = vset.pattern.permute.xlu1 %v1422_v2  ;;  %1271 = vmatpush1.bf16.msra.mxu1 %v1224_v36  ;;  %v1753_v36 = vrot.slane %v565_v26, %v438_v16 }
  0x32   : > { %284 = vperm.xlu1 %1330, %v252_v31   ;;  %1226 = vmatprep.subr.bf16.mxu0 %v1423_v6 }
  0x33   : > { %673 = vperm.xlu0 %1327, %v1601_v35   ;;  %1256 = vmatprep.subr.bf16.mxu1 %v1423_v6 }
  0x34   : > { %1228 = vmatpush1.bf16.msra.mxu0 %v1227_v41 }
  0x35   : > { %1272 = vmatpush1.bf16.msra.mxu1 %v1227_v41  ;;  %1229 = vmatprep.subr.bf16.mxu0 %v1423_v6 }
  0x36   : > { %334 = vperm.xlu1 %1330, %v1612_v39   ;;  %1257 = vmatprep.subr.bf16.mxu1 %v1423_v6 }
  0x37   : > { %677 = vperm.xlu0 %1327, %v1616_v40  }
  0x38   : > { %1231 = vmatpush1.bf16.msra.mxu0 %v1230_v45 }
  0x39   : > { %1273 = vmatpush1.bf16.msra.mxu1 %v1230_v45  ;;  %1232 = vmatprep.subr.bf16.mxu0 %v1423_v6 }
  0x3a   : > { %1331 = vset.pattern.permute.xlu1 %v1424_v25  ;;  %1258 = vmatprep.subr.bf16.mxu1 %v1423_v6 }
  0x3b   : > { %705 = vperm.xlu1 %1331, %v1560_v20   ;;  %681 = vperm.xlu0 %1327, %v1629_v44  }
  0x3c   : > { %1234 = vmatpush1.bf16.msra.mxu0 %v1233_v49 }
  0x3d   : > { %1274 = vmatpush1.bf16.msra.mxu1 %v1233_v49  ;;  %1235 = vmatprep.subr.bf16.mxu0 %v1423_v6 }
  0x3e   : > { %1259 = vmatprep.subr.bf16.mxu1 %v1423_v6 }
  0x3f   : > { %1332 = vset.pattern.permute.xlu1 %v1421_v1  ;;  %685 = vperm.xlu0 %1327, %v1642_v48  }
  0x40   : > { %491 = vperm.xlu1 %1332, %v252_v31   ;;  %1237 = vmatpush1.bf16.msra.mxu0 %v1236_v53  ;;  %v1747_v31 = vrot.slane %v271_v22, %v438_v16 }
  0x41   : > { %1275 = vmatpush1.bf16.msra.mxu1 %v1236_v53  ;;  %1238 = vmatprep.subr.bf16.mxu0 %v1423_v6 }
  0x42   : > { %1260 = vmatprep.subr.bf16.mxu1 %v1423_v6 }
  0x43   : > { %689 = vperm.xlu0 %1327, %v1656_v52  }
  0x44   : > { %1333 = vset.pattern.permute.xlu1 %v1422_v2  ;;  %1240 = vmatpush1.bf16.msra.mxu0 %v1239_v57 }
  0x45   : > { %289 = vperm.xlu1 %1333, %v1601_v35   ;;  %1276 = vmatpush1.bf16.msra.mxu1 %v1239_v57 }
  0x46   : > { %1241 = vmatprep.subr.bf16.mxu0 %v1423_v6  ;;  %1261 = vmatprep.subr.bf16.mxu1 %v1423_v6 }
  0x47   : > { %693 = vperm.xlu0 %1327, %v1670_v56  }
  0x48   : > { %1243 = vmatpush1.bf16.msra.mxu0 %v1242_v61 }
  0x49   : > { %339 = vperm.xlu1 %1333, %v263_v58   ;;  %1277 = vmatpush1.bf16.msra.mxu1 %v1242_v61 }
  0x4a   : > { %1244 = vmatprep.subr.bf16.mxu0 %v1423_v6  ;;  %1262 = vmatprep.subr.bf16.mxu1 %v1423_v6  ;;  %v1707_v6 = vld [vmem:[%s1538_s7 + $0x88] sm:$0xff] }
  0x4b   : > { %1352 = vset.pattern.permute.xlu0 %v1421_v1 }
  0x4c   : > { %527 = vperm.xlu0 %1352, %v1560_v20   ;;  %1246 = vmatpush1.bf16.msra.mxu0 %v1245_v0  ;;  %v1738_v20 = vrot.slane %v376_v14, %v375_v11 }
  0x4d   : > { %1334 = vset.pattern.permute.xlu1 %v1424_v25  ;;  %1278 = vmatpush1.bf16.msra.mxu1 %v1245_v0 }
  0x4e   : > { %709 = vperm.xlu1 %1334, %v1612_v39  }
  0x50   : > { %531 = vperm.xlu0 %1352, %v1612_v39  }
  0x52   : > { %1335 = vset.pattern.permute.xlu1 %v1421_v1 }
  0x53   : > { %495 = vperm.xlu1 %1335, %v1601_v35   ;;  %v747_v35 = vrot.slane %v270_v13, %v746_v24 }
  0x54   : > { %535 = vperm.xlu0 %1352, %v263_v58  }
  0x55   : > { %v1766_v45 = vrot.slane %v747_v35, %v742_v23 }
  0x57   : > { %1336 = vset.pattern.permute.xlu1 %v1422_v2 }
  0x58   : > { %294 = vperm.xlu1 %1336, %v1616_v40   ;;  %539 = vperm.xlu0 %1352, %v264_v3  }
  0x5c   : > { %344 = vperm.xlu1 %1336, %v264_v3   ;;  %543 = vperm.xlu0 %1352, %v265_v4  }
  0x60   : > { %1337 = vset.pattern.permute.xlu1 %v1424_v25  ;;  %547 = vperm.xlu0 %1352, %v266_v5  }
  0x61   : > { %713 = vperm.xlu1 %1337, %v263_v58  }
  0x64   : > { %551 = vperm.xlu0 %1352, %v1707_v6  }
  0x65   : > { %1338 = vset.pattern.permute.xlu1 %v1421_v1 }
  0x66   : > { %499 = vperm.xlu1 %1338, %v1616_v40  }
  0x68   : > { %555 = vperm.xlu0 %1352, %v1712_v7  }
  0x6a   : > { %1339 = vset.pattern.permute.xlu1 %v1422_v2 }
  0x6b   : > { %299 = vperm.xlu1 %1339, %v1629_v44  }
  0x6c   : > { %559 = vperm.xlu0 %1352, %v1717_v8  }
  0x6f   : > { %349 = vperm.xlu1 %1339, %v265_v4  }
  0x70   : > { %1356 = vset.pattern.permute.xlu0 %v1424_v25 }
  0x73   : > { %1340 = vset.pattern.permute.xlu1 %v1424_v25 }
  0x74   : > { %717 = vperm.xlu1 %1340, %v264_v3  }
  0x78   : > { %1341 = vset.pattern.permute.xlu1 %v1421_v1 }
  0x79   : > { %503 = vperm.xlu1 %1341, %v1629_v44   ;;  %v1764_v44 = vrot.slane %v743_v34, %v742_v23 }
  0x7d   : > { %1342 = vset.pattern.permute.xlu1 %v1422_v2 }
  0x7e   : > { %304 = vperm.xlu1 %1342, %v1642_v48  }
  0x82   : > { %354 = vperm.xlu1 %1342, %v266_v5  }
  0x86   : > { %1343 = vset.pattern.permute.xlu1 %v1424_v25 }
  0x87   : > { %721 = vperm.xlu1 %1343, %v265_v4  }
  0x8b   : > { %1344 = vset.pattern.permute.xlu1 %v1421_v1 }
  0x8c   : > { %507 = vperm.xlu1 %1344, %v1642_v48  }
  0x90   : > { %1345 = vset.pattern.permute.xlu1 %v1422_v2 }
  0x91   : > { %309 = vperm.xlu1 %1345, %v1656_v52  }
  0x95   : > { %359 = vperm.xlu1 %1345, %v1707_v6  }
  0x99   : > { %1346 = vset.pattern.permute.xlu1 %v1424_v25  ;;  %v484_v18 = vpop.permute.xlu1 %483  ;;  %v275_v19 = vpop.permute.xlu0 %274 }
  0x9a   : > { %725 = vperm.xlu1 %1346, %v266_v5   ;;  %v391_v32 = vmul.f32 %v1738_v20, %v275_v19  ;;  %v392_v33 = vmul.f32 %v1740_v21, %v275_v19  ;;  %v580_v46 = vmul.f32 %v1753_v36, %v484_v18  ;;  %v581_v47 = vmul.f32 %v1755_v37, %v484_v18 }
  0x9c   : > { %v442_v41 = vadd.f32 %v1745_v30, %v391_v32  ;;  %v443_v42 = vadd.f32 %v1747_v31, %v392_v33 }
  0x9d   : > { %v524_v28 = vpop.permute.xlu1 %523  ;;  %v325_v29 = vpop.permute.xlu0 %324 }
  0x9e   : > { %1347 = vset.pattern.permute.xlu1 %v1421_v1  ;;  %v411_v38 = vmul.f32 %v1738_v20, %v325_v29  ;;  %v412_v39 = vmul.f32 %v1740_v21, %v325_v29  ;;  %v600_v50 = vmul.f32 %v1753_v36, %v524_v28  ;;  %v601_v51 = vmul.f32 %v1755_v37, %v524_v28 }
  0x9f   : > { %511 = vperm.xlu1 %1347, %v1656_v52   ;;  %v620_v52 = vadd.f32 %v580_v46, %v442_v41  ;;  %v621_v54 = vadd.f32 %v581_v47, %v443_v42 }
  0xa0   : > { %v462_v48 = vadd.f32 %v1745_v30, %v411_v38  ;;  %v463_v49 = vadd.f32 %v1747_v31, %v412_v39 }
  0xa1   : > { %v280_v40 = vpop.permute.xlu0 %279 }
  0xa2   : > { %v1761_v43 = vpop.permute.xlu1 %329  ;;  %v393_v55 = vmul.f32 %v1738_v20, %v280_v40  ;;  %v394_v57 = vmul.f32 %v1740_v21, %v280_v40  ;;  %v640_v61 = vadd.f32 %v600_v50, %v462_v48  ;;  %v641_v0 = vadd.f32 %v601_v51, %v463_v49 }
  0xa3   : > { %1348 = vset.pattern.permute.xlu1 %v1422_v2 }
  0xa4   : > { %314 = vperm.xlu1 %1348, %v1670_v56   ;;  %v444_v11 = vadd.f32 %v1745_v30, %v393_v55  ;;  %v445_v12 = vadd.f32 %v1747_v31, %v394_v57 }
  0xa6   : > { %v662_v53 = vpop.permute.xlu0 %661 }
  0xa7   : > { %v758_v58 = vmul.f32 %v1764_v44, %v662_v53  ;;  %v759_v59 = vmul.f32 %v1766_v45, %v662_v53  ;;  %v702_v60 = vpop.permute.xlu1 %701 }
  0xa8   : > { %v778_v62 = vmul.f32 %v1764_v44, %v702_v60  ;;  %v779_v63 = vmul.f32 %v1766_v45, %v702_v60  ;;  %364 = vperm.xlu1 %1348, %v1712_v7  }
  0xa9   : > { %v798_v3 = vadd.f32 %v758_v58, %v620_v52  ;;  %v799_v4 = vadd.f32 %v759_v59, %v621_v54 }
  0xaa   : > { %v818_v5 = vadd.f32 %v778_v62, %v640_v61  ;;  %v666_v9 = vpop.permute.xlu0 %665  ;;  %v819_v10 = vadd.f32 %v779_v63, %v641_v0  ;;  %v413_v63 = vmul.f32 %v1738_v20, %v1761_v43 }
  0xab   : > { %v839_v13 = vmax.f32 %v799_v4, 0.0  ;;  %v838_v14 = vmax.f32 %v798_v3, 0.0  ;;  %v760_v15 = vmul.f32 %v1764_v44, %v666_v9  ;;  %v761_v19 = vmul.f32 %v1766_v45, %v666_v9 }
  0xac   : > { %1349 = vset.pattern.permute.xlu1 %v1424_v25  ;;  %v488_v16 = vpop.permute.xlu1 %487  ;;  %v859_v17 = vmax.f32 %v819_v10, 0.0  ;;  %v858_v18 = vmax.f32 %v818_v5, 0.0  ;;  %v464_v5 = vadd.f32 %v1745_v30, %v413_v63 }
  0xad   : > { %v582_v22 = vmul.f32 %v1753_v36, %v488_v16  ;;  %v583_v23 = vmul.f32 %v1755_v37, %v488_v16  ;;  %729 = vperm.xlu1 %1349, %v1707_v6   ;;  %981 = vmatprep.mubr.f32.mxu0 %v839_v13  ;;  %v259_v6 = vld [vmem:[%s1538_s7 + $0x48] sm:$0xff]  ;;  %s228_s7 = sand.u32 1, %s1411_s19  }
  0xae   : > { %982 = vmatmul.mubr.f32.vlgmr.msra.gmra.mrb[0].mxu0 %v838_v14  ;;  %1031 = vmatprep.mubr.f32.mxu1 %v859_v17  ;;  %v670_v24 = vpop.permute.xlu0 %669  ;;  %s1279_s8 = smul.u32 160, %s228_s7  ;;  %s2034_s12 = scalar_lea.sflag [#allocation3], %s228_s7 }
  0xaf   : > { %v622_v26 = vadd.f32 %v582_v22, %v444_v11  ;;  %v623_v27 = vadd.f32 %v583_v23, %v445_v12  ;;  %1032 = vmatmul.mubr.f32.vlgmr.msra.gmra.mrb[0].mxu1 %v858_v18  ;;  %v762_v47 = vmul.f32 %v1764_v44, %v670_v24  ;;  %v763_v48 = vmul.f32 %v1766_v45, %v670_v24 }
  0xb0   : > { %s1972_s11 = scalar_lea.vmem [#allocation2], %s1279_s8 }
  0xb1   : > { %1350 = vset.pattern.permute.xlu1 %v1421_v1  ;;  %v285_v28 = vpop.permute.xlu1 %284  ;;  %v801_v29 = vadd.f32 %v761_v19, %v623_v27  ;;  %v800_v32 = vadd.f32 %v760_v15, %v622_v26 }
  0xb2   : > { %515 = vperm.xlu1 %1350, %v1670_v56   ;;  %v1792_v33 = vpop.permute.xlu0 %673  ;;  %v395_v56 = vmul.f32 %v1738_v20, %v285_v28  ;;  %v396_v42 = vmul.f32 %v1740_v21, %v285_v28 }
  0xb3   : > { %v841_v34 = vmax.f32 %v801_v29, 0.0  ;;  %v840_v35 = vmax.f32 %v800_v32, 0.0  ;;  %v764_v27 = vmul.f32 %v1764_v44, %v1792_v33 }
  0xb4   : > { %v446_v49 = vadd.f32 %v1745_v30, %v395_v56  ;;  %v447_v50 = vadd.f32 %v1747_v31, %v396_v42 }
  0xb5   : > { %v335_v38 = vpop.permute.xlu1 %334  ;;  %986 = vmatprep.mubr.f32.mxu0 %v841_v34 }
  0xb6   : > { %1351 = vset.pattern.permute.xlu1 %v1422_v2  ;;  %987 = vmatmul.mubr.f32.gmra.mrb[2].mxu0 %v840_v35  ;;  %v1796_v39 = vpop.permute.xlu0 %677  ;;  %v416_v3 = vmul.f32 %v1740_v21, %v335_v38 }
  0xb7   : > { %319 = vperm.xlu1 %1351, %v259_v6  }
  0xb8   : > { %v467_v16 = vadd.f32 %v1747_v31, %v416_v3 }
  0xba   : > { %v706_v40 = vpop.permute.xlu1 %705  ;;  %v1798_v41 = vpop.permute.xlu0 %681 }
  0xbb   : > { %369 = vperm.xlu1 %1351, %v1717_v8   ;;  %v780_v12 = vmul.f32 %v1764_v44, %v706_v40 }
  0xbe   : > { %v1803_v46 = vpop.permute.xlu0 %685 }
  0xbf   : > { %1353 = vset.pattern.permute.xlu1 %v1424_v25  ;;  %v492_v2 = vpop.permute.xlu1 %491 }
  0xc0   : > { %v584_v51 = vmul.f32 %v1753_v36, %v492_v2  ;;  %v585_v52 = vmul.f32 %v1755_v37, %v492_v2  ;;  %733 = vperm.xlu1 %1353, %v1712_v7   ;;  %v414_v7 = vmul.f32 %v1740_v21, %v1761_v43 }
  0xc2   : > { %v624_v53 = vadd.f32 %v584_v51, %v446_v49  ;;  %v625_v54 = vadd.f32 %v585_v52, %v447_v50  ;;  %v1813_v55 = vpop.permute.xlu0 %689  ;;  %v465_v9 = vadd.f32 %v1747_v31, %v414_v7 }
  0xc4   : > { %1354 = vset.pattern.permute.xlu1 %v1421_v1  ;;  %v290_v57 = vpop.permute.xlu1 %289  ;;  %v803_v58 = vadd.f32 %v763_v48, %v625_v54  ;;  %v802_v59 = vadd.f32 %v762_v47, %v624_v53  ;;  %v415_v1 = vmul.f32 %v1738_v20, %v335_v38 }
  0xc5   : > { %519 = vperm.xlu1 %1354, %v259_v6   ;;  %v397_v17 = vmul.f32 %v1738_v20, %v290_v57  ;;  %v398_v18 = vmul.f32 %v1740_v21, %v290_v57 }
  0xc6   : > { %v1816_v60 = vpop.permute.xlu0 %693  ;;  %v843_v61 = vmax.f32 %v803_v58, 0.0  ;;  %v842_v62 = vmax.f32 %v802_v59, 0.0  ;;  %v466_v15 = vadd.f32 %v1745_v30, %v415_v1 }
  0xc7   : > { %v449_v56 = vadd.f32 %v1747_v31, %v398_v18 }
  0xc8   : > { %v340_v0 = vpop.permute.xlu1 %339  ;;  %991 = vmatprep.mubr.f32.mxu0 %v843_v61 }
  0xc9   : > { %1355 = vset.pattern.permute.xlu1 %v1424_v25  ;;  %992 = vmatmul.mubr.f32.gmra.mrb[4].mxu0 %v842_v62  ;;  %v781_v25 = vmul.f32 %v1766_v45, %v706_v40  ;;  %v448_v40 = vadd.f32 %v1745_v30, %v397_v17  ;;  %v417_v61 = vmul.f32 %v1738_v20, %v340_v0 }
  0xca   : > { %697 = vperm.xlu1 %1355, %v259_v6   ;;  %v418_v62 = vmul.f32 %v1740_v21, %v340_v0 }
  0xcb   : > { %v528_v4 = vpop.permute.xlu0 %527  ;;  %v468_v3 = vadd.f32 %v1745_v30, %v417_v61 }
  0xcc   : > { %v602_v10 = vmul.f32 %v1753_v36, %v528_v4  ;;  %v603_v11 = vmul.f32 %v1755_v37, %v528_v4  ;;  %v469_v4 = vadd.f32 %v1747_v31, %v418_v62 }
  0xcd   : > { %v710_v43 = vpop.permute.xlu1 %709 }
  0xce   : > { %v642_v13 = vadd.f32 %v602_v10, %v464_v5  ;;  %v643_v14 = vadd.f32 %v603_v11, %v465_v9  ;;  %737 = vperm.xlu1 %1355, %v1717_v8   ;;  %v765_v8 = vmul.f32 %v1766_v45, %v1792_v33  ;;  %v782_v28 = vmul.f32 %v1764_v44, %v710_v43 }
  0xcf   : > { %v532_v19 = vpop.permute.xlu0 %531  ;;  %v783_v29 = vmul.f32 %v1766_v45, %v710_v43 }
  0xd0   : > { %v604_v22 = vmul.f32 %v1753_v36, %v532_v19  ;;  %v605_v23 = vmul.f32 %v1755_v37, %v532_v19  ;;  %v821_v24 = vadd.f32 %v781_v25, %v643_v14  ;;  %v820_v26 = vadd.f32 %v780_v12, %v642_v13 }
  0xd1   : > { %v766_v14 = vmul.f32 %v1764_v44, %v1796_v39 }
  0xd2   : > { %v644_v32 = vadd.f32 %v604_v22, %v466_v15  ;;  %v645_v34 = vadd.f32 %v605_v23, %v467_v16  ;;  %v496_v35 = vpop.permute.xlu1 %495  ;;  %v861_v6 = vmax.f32 %v821_v24, 0.0  ;;  %v860_v38 = vmax.f32 %v820_v26, 0.0 }
  0xd3   : > { %v586_v42 = vmul.f32 %v1753_v36, %v496_v35  ;;  %v587_v47 = vmul.f32 %v1755_v37, %v496_v35  ;;  %v536_v59 = vpop.permute.xlu0 %535  ;;  %v767_v15 = vmul.f32 %v1766_v45, %v1796_v39 }
  0xd4   : > { %1036 = vmatprep.mubr.f32.mxu1 %v861_v6  ;;  %v823_v48 = vadd.f32 %v783_v29, %v645_v34  ;;  %v822_v33 = vadd.f32 %v782_v28, %v644_v32  ;;  %v606_v7 = vmul.f32 %v1753_v36, %v536_v59  ;;  %v607_v1 = vmul.f32 %v1755_v37, %v536_v59 }
  0xd5   : > { %v626_v2 = vadd.f32 %v586_v42, %v448_v40  ;;  %v627_v49 = vadd.f32 %v587_v47, %v449_v56  ;;  %1037 = vmatmul.mubr.f32.gmra.mrb[2].mxu1 %v860_v38 }
  0xd6   : > { %v863_v50 = vmax.f32 %v823_v48, 0.0  ;;  %v862_v51 = vmax.f32 %v822_v33, 0.0  ;;  %v646_v9 = vadd.f32 %v606_v7, %v468_v3  ;;  %v647_v10 = vadd.f32 %v607_v1, %v469_v4 }
  0xd7   : > { %v295_v52 = vpop.permute.xlu1 %294  ;;  %v805_v53 = vadd.f32 %v765_v8, %v627_v49  ;;  %v804_v54 = vadd.f32 %v764_v27, %v626_v2  ;;  %v540_v6 = vpop.permute.xlu0 %539 }
  0xd8   : > { %1041 = vmatprep.mubr.f32.mxu1 %v863_v50  ;;  %v399_v0 = vmul.f32 %v1738_v20, %v295_v52  ;;  %v400_v12 = vmul.f32 %v1740_v21, %v295_v52  ;;  %v608_v42 = vmul.f32 %v1753_v36, %v540_v6  ;;  %v609_v47 = vmul.f32 %v1755_v37, %v540_v6 }
  0xd9   : > { %1042 = vmatmul.mubr.f32.gmra.mrb[4].mxu1 %v862_v51  ;;  %v845_v57 = vmax.f32 %v805_v53, 0.0  ;;  %v844_v58 = vmax.f32 %v804_v54, 0.0 }
  0xda   : > { %v450_v19 = vadd.f32 %v1745_v30, %v399_v0  ;;  %v451_v22 = vadd.f32 %v1747_v31, %v400_v12 }
  0xdb   : > { %v345_v63 = vpop.permute.xlu1 %344  ;;  %996 = vmatprep.mubr.f32.mxu0 %v845_v57  ;;  %v768_v57 = vmul.f32 %v1764_v44, %v1798_v41 }
  0xdc   : > { %997 = vmatmul.mubr.f32.gmra.mrb[6].mxu0 %v844_v58  ;;  %v419_v39 = vmul.f32 %v1738_v20, %v345_v63  ;;  %v420_v32 = vmul.f32 %v1740_v21, %v345_v63  ;;  %v769_v58 = vmul.f32 %v1766_v45, %v1798_v41 }
  0xde   : > { %v470_v40 = vadd.f32 %v1745_v30, %v419_v39  ;;  %v471_v56 = vadd.f32 %v1747_v31, %v420_v32 }
  0xe0   : > { %v714_v5 = vpop.permute.xlu1 %713  ;;  %v648_v33 = vadd.f32 %v608_v42, %v470_v40  ;;  %v649_v2 = vadd.f32 %v609_v47, %v471_v56  ;;  %v770_v40 = vmul.f32 %v1764_v44, %v1803_v46  ;;  %v771_v56 = vmul.f32 %v1766_v45, %v1803_v46 }
  0xe1   : > { %v784_v11 = vmul.f32 %v1764_v44, %v714_v5  ;;  %v785_v43 = vmul.f32 %v1766_v45, %v714_v5 }
  0xe3   : > { %v824_v25 = vadd.f32 %v784_v11, %v646_v9  ;;  %v825_v13 = vadd.f32 %v785_v43, %v647_v10 }
  0xe5   : > { %v500_v16 = vpop.permute.xlu1 %499  ;;  %v865_v17 = vmax.f32 %v825_v13, 0.0  ;;  %v864_v18 = vmax.f32 %v824_v25, 0.0  ;;  %v544_v25 = vpop.permute.xlu0 %543 }
  0xe6   : > { %v588_v23 = vmul.f32 %v1753_v36, %v500_v16  ;;  %v589_v24 = vmul.f32 %v1755_v37, %v500_v16  ;;  %v610_v16 = vmul.f32 %v1753_v36, %v544_v25 }
  0xe7   : > { %1046 = vmatprep.mubr.f32.mxu1 %v865_v17  ;;  %v611_v17 = vmul.f32 %v1755_v37, %v544_v25 }
  0xe8   : > { %v628_v26 = vadd.f32 %v588_v23, %v450_v19  ;;  %v629_v27 = vadd.f32 %v589_v24, %v451_v22  ;;  %1047 = vmatmul.mubr.f32.gmra.mrb[6].mxu1 %v864_v18 }
  0xea   : > { %v300_v8 = vpop.permute.xlu1 %299  ;;  %v807_v28 = vadd.f32 %v767_v15, %v629_v27  ;;  %v806_v29 = vadd.f32 %v766_v14, %v628_v26 }
  0xeb   : > { %v401_v51 = vmul.f32 %v1738_v20, %v300_v8  ;;  %v402_v52 = vmul.f32 %v1740_v21, %v300_v8 }
  0xec   : > { %v847_v34 = vmax.f32 %v807_v28, 0.0  ;;  %v846_v35 = vmax.f32 %v806_v29, 0.0 }
  0xed   : > { %v452_v63 = vadd.f32 %v1745_v30, %v401_v51  ;;  %v453_v7 = vadd.f32 %v1747_v31, %v402_v52 }
  0xee   : > { %v350_v38 = vpop.permute.xlu1 %349  ;;  %1001 = vmatprep.mubr.f32.mxu0 %v847_v34 }
  0xef   : > { %1002 = vmatmul.mubr.f32.gmra.mrb[8].mxu0 %v846_v35  ;;  %v421_v41 = vmul.f32 %v1738_v20, %v350_v38  ;;  %v422_v43 = vmul.f32 %v1740_v21, %v350_v38 }
  0xf1   : > { %v472_v14 = vadd.f32 %v1745_v30, %v421_v41  ;;  %v473_v15 = vadd.f32 %v1747_v31, %v422_v43 }
  0xf3   : > { %v718_v48 = vpop.permute.xlu1 %717  ;;  %v650_v19 = vadd.f32 %v610_v16, %v472_v14  ;;  %v651_v22 = vadd.f32 %v611_v17, %v473_v15  ;;  %v773_v14 = vmul.f32 %v1766_v45, %v1813_v55 }
  0xf4   : > { %v786_v49 = vmul.f32 %v1764_v44, %v718_v48  ;;  %v787_v50 = vmul.f32 %v1766_v45, %v718_v48 }
  0xf6   : > { %v826_v53 = vadd.f32 %v786_v49, %v648_v33  ;;  %v827_v54 = vadd.f32 %v787_v50, %v649_v2 }
  0xf8   : > { %v504_v59 = vpop.permute.xlu1 %503  ;;  %v867_v61 = vmax.f32 %v827_v54, 0.0  ;;  %v866_v62 = vmax.f32 %v826_v53, 0.0  ;;  %v548_v53 = vpop.permute.xlu0 %547 }
  0xf9   : > { %v590_v1 = vmul.f32 %v1753_v36, %v504_v59  ;;  %v591_v3 = vmul.f32 %v1755_v37, %v504_v59  ;;  %v613_v59 = vmul.f32 %v1755_v37, %v548_v53 }
  0xfa   : > { %1051 = vmatprep.mubr.f32.mxu1 %v867_v61 }
  0xfb   : > { %v630_v4 = vadd.f32 %v590_v1, %v452_v63  ;;  %v631_v5 = vadd.f32 %v591_v3, %v453_v7  ;;  %1052 = vmatmul.mubr.f32.gmra.mrb[8].mxu1 %v866_v62 }
  0xfd   : > { %v305_v9 = vpop.permute.xlu1 %304  ;;  %v809_v10 = vadd.f32 %v769_v58, %v631_v5  ;;  %v808_v11 = vadd.f32 %v768_v57, %v630_v4  ;;  %v612_v58 = vmul.f32 %v1753_v36, %v548_v53  ;;  %v774_v53 = vmul.f32 %v1764_v44, %v1816_v60 }
  0xfe   : > { %v403_v26 = vmul.f32 %v1738_v20, %v305_v9  ;;  %v404_v27 = vmul.f32 %v1740_v21, %v305_v9 }
  0xff   : > { %v849_v0 = vmax.f32 %v809_v10, 0.0  ;;  %v848_v12 = vmax.f32 %v808_v11, 0.0 }
 0x100   : > { %v454_v34 = vadd.f32 %v1745_v30, %v403_v26  ;;  %v455_v35 = vadd.f32 %v1747_v31, %v404_v27  ;;  %v552_v27 = vpop.permute.xlu0 %551 }
 0x101   : > { %v355_v13 = vpop.permute.xlu1 %354  ;;  %1006 = vmatprep.mubr.f32.mxu0 %v849_v0 }
 0x102   : > { %1007 = vmatmul.mubr.f32.gmra.mrb[10].mxu0 %v848_v12  ;;  %v423_v49 = vmul.f32 %v1738_v20, %v355_v13  ;;  %v424_v50 = vmul.f32 %v1740_v21, %v355_v13  ;;  %v772_v13 = vmul.f32 %v1764_v44, %v1813_v55 }
 0x104   : > { %v474_v57 = vadd.f32 %v1745_v30, %v423_v49  ;;  %v475_v46 = vadd.f32 %v1747_v31, %v424_v50 }
 0x106   : > { %v722_v18 = vpop.permute.xlu1 %721  ;;  %v652_v62 = vadd.f32 %v612_v58, %v474_v57  ;;  %v653_v63 = vadd.f32 %v613_v59, %v475_v46 }
 0x107   : > { %v788_v23 = vmul.f32 %v1764_v44, %v722_v18  ;;  %v789_v24 = vmul.f32 %v1766_v45, %v722_v18 }
 0x109   : > { %v828_v8 = vadd.f32 %v788_v23, %v650_v19  ;;  %v829_v28 = vadd.f32 %v789_v24, %v651_v22 }
 0x10b   : > { %v508_v29 = vpop.permute.xlu1 %507  ;;  %v869_v39 = vmax.f32 %v829_v28, 0.0  ;;  %v868_v32 = vmax.f32 %v828_v8, 0.0 }
 0x10c   : > { %v592_v6 = vmul.f32 %v1753_v36, %v508_v29  ;;  %v593_v38 = vmul.f32 %v1755_v37, %v508_v29  ;;  %v614_v29 = vmul.f32 %v1753_v36, %v552_v27 }
 0x10d   : > { %1056 = vmatprep.mubr.f32.mxu1 %v869_v39  ;;  %v615_v39 = vmul.f32 %v1755_v37, %v552_v27 }
 0x10e   : > { %v632_v42 = vadd.f32 %v592_v6, %v454_v34  ;;  %v633_v47 = vadd.f32 %v593_v38, %v455_v35  ;;  %1057 = vmatmul.mubr.f32.gmra.mrb[10].mxu1 %v868_v32 }
 0x110   : > { %v310_v48 = vpop.permute.xlu1 %309  ;;  %v811_v33 = vadd.f32 %v771_v56, %v633_v47  ;;  %v810_v2 = vadd.f32 %v770_v40, %v632_v42 }
 0x111   : > { %v405_v3 = vmul.f32 %v1738_v20, %v310_v48  ;;  %v406_v4 = vmul.f32 %v1740_v21, %v310_v48 }
 0x112   : > { %v851_v51 = vmax.f32 %v811_v33, 0.0  ;;  %v850_v52 = vmax.f32 %v810_v2, 0.0 }
 0x113   : > { %v456_v43 = vadd.f32 %v1745_v30, %v405_v3  ;;  %v457_v0 = vadd.f32 %v1747_v31, %v406_v4  ;;  %v556_v4 = vpop.permute.xlu0 %555 }
 0x114   : > { %v360_v54 = vpop.permute.xlu1 %359  ;;  %1011 = vmatprep.mubr.f32.mxu0 %v851_v51 }
 0x115   : > { %1012 = vmatmul.mubr.f32.gmra.mrb[12].mxu0 %v850_v52  ;;  %v425_v22 = vmul.f32 %v1738_v20, %v360_v54  ;;  %v426_v23 = vmul.f32 %v1740_v21, %v360_v54  ;;  %v775_v54 = vmul.f32 %v1766_v45, %v1816_v60 }
 0x117   : > { %v476_v28 = vadd.f32 %v1745_v30, %v425_v22  ;;  %v477_v55 = vadd.f32 %v1747_v31, %v426_v23 }
 0x119   : > { %v726_v61 = vpop.permute.xlu1 %725  ;;  %v654_v34 = vadd.f32 %v614_v29, %v476_v28  ;;  %v655_v35 = vadd.f32 %v615_v39, %v477_v55 }
 0x11a   : > { %v790_v7 = vmul.f32 %v1764_v44, %v726_v61  ;;  %v791_v1 = vmul.f32 %v1766_v45, %v726_v61 }
 0x11c   : > { %v830_v5 = vadd.f32 %v790_v7, %v652_v62  ;;  %v831_v9 = vadd.f32 %v791_v1, %v653_v63 }
 0x11e   : > { %v512_v10 = vpop.permute.xlu1 %511  ;;  %v871_v11 = vmax.f32 %v831_v9, 0.0  ;;  %v870_v41 = vmax.f32 %v830_v5, 0.0  ;;  %v616_v9 = vmul.f32 %v1753_v36, %v556_v4 }
 0x11f   : > { %v594_v12 = vmul.f32 %v1753_v36, %v512_v10  ;;  %v595_v25 = vmul.f32 %v1755_v37, %v512_v10  ;;  %v617_v10 = vmul.f32 %v1755_v37, %v556_v4 }
 0x120   : > { %1061 = vmatprep.mubr.f32.mxu1 %v871_v11 }
 0x121   : > { %v634_v15 = vadd.f32 %v594_v12, %v456_v43  ;;  %v635_v16 = vadd.f32 %v595_v25, %v457_v0  ;;  %1062 = vmatmul.mubr.f32.gmra.mrb[12].mxu1 %v870_v41 }
 0x123   : > { %v315_v17 = vpop.permute.xlu1 %314  ;;  %v813_v18 = vadd.f32 %v773_v14, %v635_v16  ;;  %v812_v19 = vadd.f32 %v772_v13, %v634_v15 }
 0x124   : > { %v407_v40 = vmul.f32 %v1738_v20, %v315_v17  ;;  %v408_v56 = vmul.f32 %v1740_v21, %v315_v17 }
 0x125   : > { %v853_v24 = vmax.f32 %v813_v18, 0.0  ;;  %v852_v26 = vmax.f32 %v812_v19, 0.0 }
 0x126   : > { %v458_v49 = vadd.f32 %v1745_v30, %v407_v40  ;;  %v459_v50 = vadd.f32 %v1747_v31, %v408_v56 }
 0x127   : > { %v365_v8 = vpop.permute.xlu1 %364  ;;  %1016 = vmatprep.mubr.f32.mxu0 %v853_v24 }
 0x128   : > { %1017 = vmatmul.mubr.f32.gmra.mrb[14].mxu0 %v852_v26  ;;  %v427_v62 = vmul.f32 %v1738_v20, %v365_v8  ;;  %v428_v63 = vmul.f32 %v1740_v21, %v365_v8  ;;  %v560_v26 = vpop.permute.xlu0 %559 }
 0x12a   : > { %v478_v5 = vadd.f32 %v1745_v30, %v427_v62  ;;  %v479_v60 = vadd.f32 %v1747_v31, %v428_v63 }
 0x12c   : > { %v730_v32 = vpop.permute.xlu1 %729  ;;  %v656_v41 = vadd.f32 %v616_v9, %v478_v5  ;;  %v657_v43 = vadd.f32 %v617_v10, %v479_v60 }
 0x12d   : > { %v792_v6 = vmul.f32 %v1764_v44, %v730_v32  ;;  %v793_v38 = vmul.f32 %v1766_v45, %v730_v32 }
 0x12f   : > { %v832_v42 = vadd.f32 %v792_v6, %v654_v34  ;;  %v833_v47 = vadd.f32 %v793_v38, %v655_v35  ;;  %v618_v34 = vmul.f32 %v1753_v36, %v560_v26  ;;  %v619_v35 = vmul.f32 %v1755_v37, %v560_v26 }
 0x131   : > { %v516_v48 = vpop.permute.xlu1 %515  ;;  %v873_v33 = vmax.f32 %v833_v47, 0.0  ;;  %v872_v2 = vmax.f32 %v832_v42, 0.0 }
 0x132   : > { %v596_v51 = vmul.f32 %v1753_v36, %v516_v48  ;;  %v597_v52 = vmul.f32 %v1755_v37, %v516_v48 }
 0x133   : > { %1066 = vmatprep.mubr.f32.mxu1 %v873_v33 }
 0x134   : > { %v636_v57 = vadd.f32 %v596_v51, %v458_v49  ;;  %v637_v46 = vadd.f32 %v597_v52, %v459_v50  ;;  %1067 = vmatmul.mubr.f32.gmra.mrb[14].mxu1 %v872_v2 }
 0x136   : > { %v320_v58 = vpop.permute.xlu1 %319  ;;  %v815_v59 = vadd.f32 %v775_v54, %v637_v46  ;;  %v814_v61 = vadd.f32 %v774_v53, %v636_v57 }
 0x137   : > { %v409_v14 = vmul.f32 %v1738_v20, %v320_v58  ;;  %v410_v15 = vmul.f32 %v1740_v21, %v320_v58 }
 0x138   : > { %v855_v7 = vmax.f32 %v815_v59, 0.0  ;;  %v854_v1 = vmax.f32 %v814_v61, 0.0 }
 0x139   : > { %v460_v27 = vadd.f32 %v1745_v30, %v409_v14  ;;  %v461_v8 = vadd.f32 %v1747_v31, %v410_v15 }
 0x13a   : > { %v370_v3 = vpop.permute.xlu1 %369  ;;  %1021 = vmatprep.mubr.f32.mxu0 %v855_v7 }
 0x13b   : > { %1022 = vmatmul.mubr.f32.gmra.mrb[16].mxu0 %v854_v1  ;;  %v429_v19 = vmul.f32 %v1738_v20, %v370_v3  ;;  %v430_v22 = vmul.f32 %v1740_v21, %v370_v3 }
 0x13d   : > { %v480_v28 = vadd.f32 %v1745_v30, %v429_v19  ;;  %v481_v55 = vadd.f32 %v1747_v31, %v430_v22 }
 0x13f   : > { %v734_v11 = vpop.permute.xlu1 %733  ;;  %v658_v56 = vadd.f32 %v618_v34, %v480_v28  ;;  %v659_v42 = vadd.f32 %v619_v35, %v481_v55 }
 0x140   : > { %v794_v0 = vmul.f32 %v1764_v44, %v734_v11  ;;  %v795_v12 = vmul.f32 %v1766_v45, %v734_v11 }
 0x142   : > { %v834_v25 = vadd.f32 %v794_v0, %v656_v41  ;;  %v835_v13 = vadd.f32 %v795_v12, %v657_v43 }
 0x144   : > { %v520_v16 = vpop.permute.xlu1 %519  ;;  %v875_v17 = vmax.f32 %v835_v13, 0.0  ;;  %v874_v18 = vmax.f32 %v834_v25, 0.0 }
 0x145   : > { %v598_v23 = vmul.f32 %v1753_v36, %v520_v16  ;;  %v599_v24 = vmul.f32 %v1755_v37, %v520_v16  ;;  %v1968_v37 = vld [vmem:[%s2099_s4] ss:$0 sm:$0xff] }
 0x146   : > { %1071 = vmatprep.mubr.f32.mxu1 %v875_v17 }
 0x147   : > { %1072 = vmatmul.mubr.f32.gmra.mrb[16].mxu1 %v874_v18  ;;  %v638_v39 = vadd.f32 %v598_v23, %v460_v27  ;;  %v639_v20 = vadd.f32 %v599_v24, %v461_v8 }
 0x149   : > { %v698_v29 = vpop.permute.xlu1 %697 }
 0x14a   : > { %v776_v21 = vmul.f32 %v1764_v44, %v698_v29  ;;  %v777_v32 = vmul.f32 %v1766_v45, %v698_v29 }
 0x14c   : > { %v816_v6 = vadd.f32 %v776_v21, %v638_v39  ;;  %v817_v38 = vadd.f32 %v777_v32, %v639_v20 }
 0x14d   : > { %v738_v40 = vpop.permute.xlu1 %737 }
 0x14e   : > { %v796_v30 = vmul.f32 %v1764_v44, %v738_v40  ;;  %v797_v31 = vmul.f32 %v1766_v45, %v738_v40  ;;  %v857_v47 = vmax.f32 %v817_v38, 0.0  ;;  %v856_v48 = vmax.f32 %v816_v6, 0.0 }
 0x150   : > { %v836_v33 = vadd.f32 %v796_v30, %v658_v56  ;;  %v837_v2 = vadd.f32 %v797_v31, %v659_v42  ;;  %1026 = vmatprep.mubr.f32.mxu0 %v857_v47 }
 0x151   : > { %1027 = vmatmul.mubr.f32.gmra.mrb[18].mxu0 %v856_v48 }
 0x152   : > { %v876_v49 = vmax.f32 %v836_v33, 0.0  ;;  %v877_v36 = vmax.f32 %v837_v2, 0.0 }
 0x154   : > { %1076 = vmatprep.mubr.f32.mxu1 %v877_v36 }
 0x155   : > { %1077 = vmatmul.mubr.f32.gmra.mrb[18].mxu1 %v876_v49 }
 0x181   : > { %v983_v44 = vpop.f32.mrb[0].mxu0 }
 0x182   : > { %v984_v45 = vadd.f32 %v1968_v37, %v983_v44  ;;  %v985_v50 = vpop.f32.mrb[1].mxu0  ;;  %v1033_v51 = vpop.f32.mrb[0].mxu1 }
 0x183   : > { %v1034_v52 = vadd.f32 %v1968_v37, %v1033_v51  ;;  %v1035_v53 = vpop.f32.mrb[1].mxu1 }
 0x184   : > { %1083 = vst.msk [vmem:[%s1972_s11] sm:$0xff] %vm1082_vm0, %v984_v45 }
 0x185   : > { %1093 = vst.msk [vmem:[%s1972_s11 + $0x50] sm:$0xff] %vm1082_vm0, %v1034_v52 }
 0x189   : > { %v988_v54 = vpop.f32.mrb[2].mxu0 }
 0x18a   : > { %v989_v57 = vadd.f32 %v1968_v37, %v988_v54  ;;  %v990_v46 = vpop.f32.mrb[3].mxu0 }
 0x18c   : > { %1084 = vst.msk [vmem:[%s1972_s11 + $0x8] sm:$0xff] %vm1082_vm0, %v989_v57 }
 0x19c   : > { %v993_v58 = vpop.f32.mrb[4].mxu0 }
 0x19d   : > { %v994_v59 = vadd.f32 %v1968_v37, %v993_v58  ;;  %v995_v61 = vpop.f32.mrb[5].mxu0 }
 0x19f   : > { %1085 = vst.msk [vmem:[%s1972_s11 + $0x10] sm:$0xff] %vm1082_vm0, %v994_v59 }
 0x1a8   : > { %v1038_v62 = vpop.f32.mrb[2].mxu1 }
 0x1a9   : > { %v1039_v63 = vadd.f32 %v1968_v37, %v1038_v62  ;;  %v1040_v7 = vpop.f32.mrb[3].mxu1 }
 0x1ab   : > { %1094 = vst.msk [vmem:[%s1972_s11 + $0x58] sm:$0xff] %vm1082_vm0, %v1039_v63 }
 0x1ac   : > { %v1043_v1 = vpop.f32.mrb[4].mxu1 }
 0x1ad   : > { %v1044_v3 = vadd.f32 %v1968_v37, %v1043_v1  ;;  %v1045_v4 = vpop.f32.mrb[5].mxu1 }
 0x1af   : > { %1095 = vst.msk [vmem:[%s1972_s11 + $0x60] sm:$0xff] %vm1082_vm0, %v1044_v3  ;;  %v998_v5 = vpop.f32.mrb[6].mxu0 }
 0x1b0   : > { %v999_v60 = vadd.f32 %v1968_v37, %v998_v5  ;;  %v1000_v9 = vpop.f32.mrb[7].mxu0 }
 0x1b2   : > { %1086 = vst.msk [vmem:[%s1972_s11 + $0x18] sm:$0xff] %vm1082_vm0, %v999_v60 }
 0x1bb   : > { %v1048_v10 = vpop.f32.mrb[6].mxu1 }
 0x1bc   : > { %v1049_v11 = vadd.f32 %v1968_v37, %v1048_v10  ;;  %v1050_v41 = vpop.f32.mrb[7].mxu1 }
 0x1be   : > { %1096 = vst.msk [vmem:[%s1972_s11 + $0x68] sm:$0xff] %vm1082_vm0, %v1049_v11 }
 0x1c2   : > { %v1003_v43 = vpop.f32.mrb[8].mxu0 }
 0x1c3   : > { %v1004_v0 = vadd.f32 %v1968_v37, %v1003_v43  ;;  %v1005_v12 = vpop.f32.mrb[9].mxu0 }
 0x1c5   : > { %1087 = vst.msk [vmem:[%s1972_s11 + $0x20] sm:$0xff] %vm1082_vm0, %v1004_v0 }
 0x1ce   : > { %v1053_v25 = vpop.f32.mrb[8].mxu1 }
 0x1cf   : > { %v1054_v13 = vadd.f32 %v1968_v37, %v1053_v25  ;;  %v1055_v14 = vpop.f32.mrb[9].mxu1 }
 0x1d1   : > { %1097 = vst.msk [vmem:[%s1972_s11 + $0x70] sm:$0xff] %vm1082_vm0, %v1054_v13 }
 0x1d5   : > { %v1008_v15 = vpop.f32.mrb[10].mxu0 }
 0x1d6   : > { %v1009_v16 = vadd.f32 %v1968_v37, %v1008_v15  ;;  %v1010_v17 = vpop.f32.mrb[11].mxu0 }
 0x1d8   : > { %1088 = vst.msk [vmem:[%s1972_s11 + $0x28] sm:$0xff] %vm1082_vm0, %v1009_v16 }
 0x1e1   : > { %v1058_v18 = vpop.f32.mrb[10].mxu1 }
 0x1e2   : > { %v1059_v19 = vadd.f32 %v1968_v37, %v1058_v18  ;;  %v1060_v22 = vpop.f32.mrb[11].mxu1 }
 0x1e4   : > { %1098 = vst.msk [vmem:[%s1972_s11 + $0x78] sm:$0xff] %vm1082_vm0, %v1059_v19 }
 0x1e8   : > { %v1013_v23 = vpop.f32.mrb[12].mxu0 }
 0x1e9   : > { %v1014_v24 = vadd.f32 %v1968_v37, %v1013_v23  ;;  %v1015_v26 = vpop.f32.mrb[13].mxu0 }
 0x1eb   : > { %1089 = vst.msk [vmem:[%s1972_s11 + $0x30] sm:$0xff] %vm1082_vm0, %v1014_v24 }
 0x1f4   : > { %v1063_v27 = vpop.f32.mrb[12].mxu1 }
 0x1f5   : > { %v1064_v8 = vadd.f32 %v1968_v37, %v1063_v27  ;;  %v1065_v28 = vpop.f32.mrb[13].mxu1 }
 0x1f7   : > { %1099 = vst.msk [vmem:[%s1972_s11 + $0x80] sm:$0xff] %vm1082_vm0, %v1064_v8 }
 0x1fb   : > { %v1018_v55 = vpop.f32.mrb[14].mxu0 }
 0x1fc   : > { %v1019_v29 = vadd.f32 %v1968_v37, %v1018_v55  ;;  %v1020_v39 = vpop.f32.mrb[15].mxu0 }
 0x1fe   : > { %1090 = vst.msk [vmem:[%s1972_s11 + $0x38] sm:$0xff] %vm1082_vm0, %v1019_v29 }
 0x207   : > { %v1068_v20 = vpop.f32.mrb[14].mxu1 }
 0x208   : > { %v1069_v21 = vadd.f32 %v1968_v37, %v1068_v20  ;;  %v1070_v32 = vpop.f32.mrb[15].mxu1 }
 0x20a   : > { %1100 = vst.msk [vmem:[%s1972_s11 + $0x88] sm:$0xff] %vm1082_vm0, %v1069_v21 }
 0x20e   : > { %v1023_v34 = vpop.f32.mrb[16].mxu0 }
 0x20f   : > { %v1024_v35 = vadd.f32 %v1968_v37, %v1023_v34  ;;  %v1025_v6 = vpop.f32.mrb[17].mxu0 }
 0x211   : > { %1091 = vst.msk [vmem:[%s1972_s11 + $0x40] sm:$0xff] %vm1082_vm0, %v1024_v35 }
 0x21a   : > { %v1073_v38 = vpop.f32.mrb[16].mxu1 }
 0x21b   : > { %v1074_v40 = vadd.f32 %v1968_v37, %v1073_v38  ;;  %v1075_v56 = vpop.f32.mrb[17].mxu1 }
 0x21d   : > { %1101 = vst.msk [vmem:[%s1972_s11 + $0x90] sm:$0xff] %vm1082_vm0, %v1074_v40 }
 0x224   : > { %v1028_v42 = vpop.f32.mrb[18].mxu0 }
 0x225   : > { %v1029_v30 = vadd.f32 %v1968_v37, %v1028_v42  ;;  %v1030_v31 = vpop.f32.mrb[19].mxu0  ;;  %1110 = sbr.rel (!%p1496_p5) target bundleno = 584 (0x248), region = 44 }
 0x227   : > { %1092 = vst.msk [vmem:[%s1972_s11 + $0x48] sm:$0xff] %vm1082_vm0, %v1029_v30 }
 0x228   : > { %v1078_v47 = vpop.f32.mrb[18].mxu1 }
 0x229   : > { %v1079_v48 = vadd.f32 %v1968_v37, %v1078_v47  ;;  %v1080_v33 = vpop.f32.mrb[19].mxu1 }
 0x22b   : > { %1102 = vst.msk [vmem:[%s1972_s11 + $0x98] sm:$0xff] %vm1082_vm0, %v1079_v48 }
 0x22c   : > { %s2108_s13 = smov (!%p1113_p11, %s1112_s13), 20 }
 0x22d   : > { %s2039_s14 = sshll.u32 %s2108_s13, 7 }
 0x22e   : > { %s1117_s15 = ssub.s32 2560, %s2039_s14 }
 0x22f   : > { %1118 = vsyncadd %s2034_s12, %s1117_s15  ;;  %p1192_p12 = scmp.ne.s32.totalorder %s2039_s14, 0  ;;  %s1198_s16 = smul.u32 2560, %s1479_s22 }
 0x230   : > { %s1123_s17 = sshll.u32 %s1972_s11, 4  ;;  %s1425_s26 = smov [#allocation2]   ;;  %s2051_s17 = int_to_ptr.vmem [resolvable:$true] %s1123_s17 }
 0x231   : > { %s2049_s25 = scalar_lea.hbm %s2100_s5, %s1198_s16  ;;  %s1357_s30 = scalar_lea.vmem %s2051_s17, %s2039_s14 }
 0x232   : > { %p1358_p13 = scmp.ne.s32.totalorder %s2051_s17, %s1357_s30  ;;  %s1361_s6 = sshll.u32 %s1425_s26, 4  ;;  %s1362_s6 = int_to_ptr.vmem [resolvable:$false] %s1361_s6 }
 0x233   : > { %s1363_s22 = scalar_lea.vmem %s1362_s6, 5120  ;;  %p1364_p2 = scmp.lt.s32.totalorder %s2051_s17, %s1362_s6 }
 0x234   : > { %p1359_p0 = pnand %p1358_p13, %p1192_p12  ;;  %p1365_p3 = scmp.lt.s32.totalorder %s1363_s22, %s1357_s30 }
 0x236   : > { %p1360_p1 = pneg %p1359_p0  ;;  %p1366_p4 = por %p1365_p3, %p1364_p2 }
 0x238   : > { %p1367_p5 = pnand %p1366_p4, %p1360_p1 }
 0x23a   : > { %1370 = shalt.err (!%p1367_p5)
}
 0x23b   : > { %s1371_s7 = scalar_lea.hbm %s2049_s25, %s2039_s14  ;;  %s1375_s10 = scalar_lea.hbm %s2100_s5, 4864 }
 0x23c   : > { %p1372_p7 = scmp.ne.s32.totalorder %s2049_s25, %s1371_s7  ;;  %p1376_p10 = scmp.lt.u32.totalorder %s2049_s25, %s2100_s5 }
 0x23d   : > { %p1377_p11 = scmp.lt.u32.totalorder %s1375_s10, %s1371_s7  ;;  %p1379_p0 = scmp.lt.u32.totalorder %s1371_s7, %s2049_s25 }
 0x23e   : > { %p1373_p8 = pnand %p1372_p7, %p1192_p12 }
 0x23f   : > { %p1378_p13 = por %p1377_p11, %p1376_p10 }
 0x240   : > { %p1374_p9 = pneg %p1373_p8 }
 0x241   : > { %p1380_p1 = por %p1379_p0, %p1378_p13 }
 0x243   : > { %p1381_p2 = pnand %p1380_p1, %p1374_p9 }
 0x245   : > { %1384 = shalt.err (!%p1381_p2)
}
 0x246   : > { %s1426_s15 = smov 128   ;;  %s1427_s16 = smov 8  }
 0x247   : > { %1129 = dma.vmem_to_hbm [thread:$0]  (%p1192_p12), %s2051_s17, %s2039_s14, %s2049_s25, %s2034_s12, %s1426_s15, %s1426_s15, %s1427_s16  }
 0x248 PF: > { %p1285_p3 = scmp.ge.s32.totalorder %s1419_s21, 2  ;;  %s1138_s28 = sand.u32 1, %s1407_s18  }
 0x249   : > { %s1139_s23 = scalar_lea.sflag [#allocation3], %s1138_s28 }
 0x24a   : > { %p1282_p4 = pnand %p1285_p3, %p1500_p6 }
 0x24c   : > { %1402 = dma.done.wait (!%p1282_p4), %s1139_s23, 2560  }
 0x24d   : > { %1404 = vsyncadd (!%p1282_p4), %s1139_s23, 4294964736  ;;  %p15_p5 = scmp.ge.s32.totalorder %s1483_s24, 4   ;;  %s2103_s18 = smov %s1411_s19 }
 0x24e   : > { %s2104_s19 = smov %s1415_s20  ;;  %s2105_s20 = smov %s1494_s27 }
 0x24f   : > { %s2106_s21 = smov %s1483_s24  ;;  %17 = sbr.rel (!%p15_p5) target bundleno = 3 (0x3), region = 75 }
 0x256   :  { %1144 = vsyncpa [#allocation3], 1 }
 0x257   :  { %1146 = vsyncpa [#allocation3 + $0x1], 1 }

</bundles_post_ra>
